<compile_context>
chip_gen: v7x
topology: tpu7x:2x2x1
jax: 0.10.0
libtpu: 0.0.40
codegen_flags: <defaults>
</compile_context>

<pallas_src>
import math

import jax
import jax.numpy as jnp
from jax.experimental import pallas as pl
from jax.experimental.pallas import tpu as pltpu


def dkfn_kernel(x_ref, h0_ref, cs0_ref, rh0_ref, rcs0_ref,
                M_ref, Wbig_ref, bbig_ref, anw_ref, c_ref,
                out_ref,
                h_scr, cs_scr, rh_scr, rcs_scr, big_scr):
    F = h_scr.shape[1]
    KF = M_ref.shape[1]
    IN = big_scr.shape[1]           # F + K*F + F + F
    t = pl.program_id(0)

    # Load the caller-provided initial state into the VMEM carry on step 0.
    @pl.when(t == 0)
    def _():
        h_scr[...] = h0_ref[...]
        cs_scr[...] = cs0_ref[...]
        rh_scr[...] = rh0_ref[...]
        rcs_scr[...] = rcs0_ref[...]

    x = x_ref[...]                  # (B, F) f32 (streamed per time step)
    H = h_scr[...]
    CS = cs_scr[...]
    rH = rh_scr[...]
    rCS = rcs_scr[...]

    mxu_dt = M_ref.dtype            # f32, or bf16 on v6e/v7x

    # K graph convolutions as one matmul against pre-masked / pre-transposed M.
    gc = jnp.dot(x.astype(mxu_dt), M_ref[...],
                 preferred_element_type=jnp.float32)           # (B, K*F) f32

    # Assemble [x | gc | H | rH] once, then ALL 8 gate pre-activations come
    # from a single MXU matmul against the block-structured (IN, 8F) weight.
    big_scr[:, 0:F] = x
    big_scr[:, F:F + KF] = gc
    big_scr[:, F + KF:F + KF + F] = H
    big_scr[:, F + KF + F:IN] = rH
    pre = (jnp.dot(big_scr[...].astype(mxu_dt), Wbig_ref[...],
                   preferred_element_type=jnp.float32)
           + bbig_ref[...])                                    # (B, 8F) f32

    # sigmoid / tanh as two full-vreg EUP passes + one lane-mask select.
    lane = jax.lax.broadcasted_iota(jnp.int32, pre.shape, 1)
    is_tanh = ((lane >= 3 * F) & (lane < 4 * F)) | (lane >= 7 * F)
    act = jnp.where(is_tanh, jnp.tanh(pre), jax.nn.sigmoid(pre))

    f = act[:, 0:F]
    i = act[:, F:2 * F]
    o = act[:, 2 * F:3 * F]
    Cg = act[:, 3 * F:4 * F]
    rf = act[:, 4 * F:5 * F]
    ri = act[:, 5 * F:6 * F]
    ro = act[:, 6 * F:7 * F]
    rCg = act[:, 7 * F:8 * F]

    NC = CS * anw_ref[...]          # Anw pre-broadcast to (B, F) in prepare
    CS_new = f * NC + i * Cg
    H_new = o * jnp.tanh(CS_new)
    rCS_new = rf * rCS + ri * rCg
    rH_new = ro * jnp.tanh(rCS_new)

    # Unbiased variances, two-pass (centered) to avoid f32 cancellation.
    def _var(a):
        n = a.size
        mu = jnp.sum(a) * (1.0 / n)
        d = a - mu
        return jnp.sum(d * d) * (1.0 / (n - 1))

    var1 = _var(x)
    var2 = _var(gc)
    c = c_ref[0, 0]
    # NOTE: matches PyTorch semantics -- 0/0 if the input block is constant.
    inv_denom = 1.0 / (var1 + var2 * c)   # one scalar reciprocal, no (B,F) divide
    pred = (H_new * (var1 * c) + rH_new * var2) * inv_denom

    # Carry state for step t+1.
    h_scr[...] = H_new
    cs_scr[...] = CS_new
    rh_scr[...] = rH_new
    rcs_scr[...] = rCS_new

    # Single lane-dense packed output block: [gc | H | CS | rH | rCS | pred].
    out_ref[:, 0:KF] = gc
    out_ref[:, KF:KF + F] = H_new
    out_ref[:, KF + F:KF + 2 * F] = CS_new
    out_ref[:, KF + 2 * F:KF + 3 * F] = rH_new
    out_ref[:, KF + 3 * F:KF + 4 * F] = rCS_new
    out_ref[:, KF + 4 * F:KF + 5 * F] = pred


def dkfn_prepare_params(A_stack, W_stack, Wg, bg, rWg, rbg, nw, *,
                        K, F, B, mxu_dtype=jnp.float32):
    """One-time, parameter-only precompute (hoisted out of the kernel and out
    of the time loop).  Wg/bg are the [fl;il;ol;Cl] stacks, rWg/rbg the
    [rfl;ril;rol;rCl] stacks of the module's Linear layers."""
    masked = A_stack * W_stack                                   # (K, F, F)
    # M[in, k*F + out] = (A_k * W_k)[out, in]  ->  gc = x @ M
    M = jnp.transpose(masked, (2, 0, 1)).reshape(F, K * F)
    anw_row = (A_stack[K - 1] @ nw[0]).reshape(1, F)             # (1, F)
    anw_b = jnp.broadcast_to(anw_row, (B, F)).astype(jnp.float32)

    IN = F + K * F + F + F          # rows of [x | gc | H | rH]
    Wbig = jnp.zeros((IN, 8 * F), jnp.float32)
    Wbig = Wbig.at[0:F, 4 * F:8 * F].set(rWg[:, :F].T)               # x  -> regular gates
    Wbig = Wbig.at[F:F + K * F, 0:4 * F].set(Wg[:, :K * F].T)        # gc -> graph gates
    Wbig = Wbig.at[F + K * F:F + K * F + F, 0:4 * F].set(Wg[:, K * F:].T)   # H
    Wbig = Wbig.at[F + K * F + F:IN, 4 * F:8 * F].set(rWg[:, F:].T)         # rH

    bbig = jnp.broadcast_to(jnp.concatenate([bg, rbg], axis=1), (B, 8 * F))
    return (M.astype(mxu_dtype), Wbig.astype(mxu_dtype),
            bbig.astype(jnp.float32), anw_b)


def dkfn_scan(xs, H0, CS0, rH0, rCS0, prepared, cparam, *, K, F):
    """Run T fused DKFN steps inside ONE pallas_call (time = grid axis)."""
    T, B, _ = xs.shape
    M, Wbig, bbig, anw = prepared
    IN = Wbig.shape[0]
    GW = Wbig.shape[1]              # 8 * F
    OUT_W = K * F + 5 * F

    def const(shape):
        return pl.BlockSpec(shape, lambda t: (0,) * len(shape))

    return pl.pallas_call(
        dkfn_kernel,
        out_shape=jax.ShapeDtypeStruct((T, B, OUT_W), jnp.float32),
        grid=(T,),
        in_specs=[
            pl.BlockSpec((None, B, F), lambda t: (t, 0, 0)),   # x_t, streamed
            const((B, F)), const((B, F)), const((B, F)), const((B, F)),  # init states
            const((F, K * F)),        # M (graph conv), resident across steps
            const((IN, GW)),          # fused gate weight, resident
            const((B, GW)),           # bias, pre-broadcast, resident
            const((B, F)),            # A_{K-1} @ Neighbor_weight, pre-broadcast
            pl.BlockSpec(memory_space=pltpu.MemorySpace.SMEM),  # scalar c
        ],
        out_specs=pl.BlockSpec((None, B, OUT_W), lambda t: (t, 0, 0)),
        scratch_shapes=[
            pltpu.VMEM((B, F), jnp.float32),     # H carry
            pltpu.VMEM((B, F), jnp.float32),     # CS carry
            pltpu.VMEM((B, F), jnp.float32),     # rH carry
            pltpu.VMEM((B, F), jnp.float32),     # rCS carry
            pltpu.VMEM((B, IN), jnp.float32),    # [x|gc|H|rH] staging
        ],
        compiler_params=pltpu.CompilerParams(
            dimension_semantics=("arbitrary",)),   # sequential state carry
    )(xs, H0, CS0, rH0, rCS0, M, Wbig, bbig, anw, cparam)


def _unpack(packed, K, F):
    KF = K * F
    gc = packed[..., 0:KF]
    Hn = packed[..., KF:KF + F]
    CSn = packed[..., KF + F:KF + 2 * F]
    rHn = packed[..., KF + 2 * F:KF + 3 * F]
    rCSn = packed[..., KF + 3 * F:KF + 4 * F]
    pred = packed[..., KF + 4 * F:KF + 5 * F]
    return Hn, CSn, gc, rHn, rCSn, pred


def dkfn_forward(x, Hidden_State, Cell_State, rHidden_State, rCell_State,
                 prepared, cparam, *, K, F):
    """Single-step forward(); same return signature as the PyTorch module."""
    packed = dkfn_scan(x[None], Hidden_State, Cell_State, rHidden_State,
                       rCell_State, prepared, cparam, K=K, F=F)[0]
    return _unpack(packed, K, F)


def dkfn_loop(xs, prepared, cparam, *, K, F):
    """module.loop() core: T forward steps fused into one kernel launch with
    zero-initialized states carried in VMEM.  Returns (T, B, (K+5)*F)."""
    T, B, _ = xs.shape
    z = jnp.zeros((B, F), jnp.float32)
    return dkfn_scan(xs, z, z, z, z, prepared, cparam, K=K, F=F)
    # TODO(synk): module.loop() additionally applies fc_mo (a 1 -> pred_size
    # Linear) to the final pred; that trivial epilogue is left to plain JAX.


def dkfn_reference(x, H, CS, rH, rCS,
                   A_stack, W_stack, Wg, bg, rWg, rbg, nw, cparam, K, F):
    gc = jnp.concatenate([x @ (A_stack[k] * W_stack[k]).T for k in range(K)], axis=1)
    combined = jnp.concatenate([gc, H], axis=1)
    gates = combined @ Wg.T + bg
    f = jax.nn.sigmoid(gates[:, 0 * F:1 * F])
    i = jax.nn.sigmoid(gates[:, 1 * F:2 * F])
    o = jax.nn.sigmoid(gates[:, 2 * F:3 * F])
    Cg = jnp.tanh(gates[:, 3 * F:4 * F])
    Anw = A_stack[K - 1] @ nw[0]
    NC = CS * Anw
    CSn = f * NC + i * Cg
    Hn = o * jnp.tanh(CSn)
    rcomb = jnp.concatenate([x, rH], axis=1)
    rgates = rcomb @ rWg.T + rbg
    rf = jax.nn.sigmoid(rgates[:, 0 * F:1 * F])
    ri = jax.nn.sigmoid(rgates[:, 1 * F:2 * F])
    ro = jax.nn.sigmoid(rgates[:, 2 * F:3 * F])
    rCg = jnp.tanh(rgates[:, 3 * F:4 * F])
    rCSn = rf * rCS + ri * rCg
    rHn = ro * jnp.tanh(rCSn)
    var1 = jnp.var(x, ddof=1)
    var2 = jnp.var(gc, ddof=1)
    c = cparam[0, 0]
    pred = (Hn * var1 * c + rHn * var2) / (var1 + var2 * c)
    return Hn, CSn, gc, rHn, rCSn, pred


if __name__ == "__main__":
    F = 16   # feature_size (== hidden_size == number of graph nodes)
    K = 3    # K-hop
    B = 8    # batch
    T = 12   # time steps for the fused-loop test

    key = jax.random.PRNGKey(0)
    ks = jax.random.split(key, 13)

    # Adjacency -> column-normalized -> K-hop list (as in DKFN.__init__).
    A = jax.random.uniform(ks[0], (F, F), jnp.float32, 0.1, 1.0)
    D_inv = jnp.diag(1.0 / jnp.sum(A, axis=0))
    normA = D_inv @ A
    A_list = []
    A_temp = jnp.eye(F, dtype=jnp.float32)
    for _ in range(K):
        A_temp = jnp.minimum(A_temp @ normA, 1.0)   # Clamp_A=True (max=1.0)
        A_list.append(A_temp)
    A_stack = jnp.stack(A_list)                     # (K, F, F)

    # Deterministic parameter init (shapes per module __init__).
    stdv_f = 1.0 / math.sqrt(F)
    W_stack = jax.random.uniform(ks[1], (K, F, F), jnp.float32, -stdv_f, stdv_f)

    gin = K * F + F
    s_g = 1.0 / math.sqrt(gin)
    Wg = jax.random.uniform(ks[2], (4 * F, gin), jnp.float32, -s_g, s_g)    # [fl;il;ol;Cl]
    bg = jax.random.uniform(ks[3], (1, 4 * F), jnp.float32, -s_g, s_g)

    rin = 2 * F
    s_r = 1.0 / math.sqrt(rin)
    rWg = jax.random.uniform(ks[4], (4 * F, rin), jnp.float32, -s_r, s_r)   # [rfl;ril;rol;rCl]
    rbg = jax.random.uniform(ks[5], (1, 4 * F), jnp.float32, -s_r, s_r)

    nw = jax.random.uniform(ks[6], (1, F), jnp.float32, -stdv_f, stdv_f)    # Neighbor_weight
    cparam = jnp.ones((1, 1), jnp.float32)                                  # self.c = [1.]

    # Inputs / states.
    x = jax.random.normal(ks[7], (B, F), jnp.float32)
    H = 0.1 * jax.random.normal(ks[8], (B, F), jnp.float32)
    CS = 0.1 * jax.random.normal(ks[9], (B, F), jnp.float32)
    rH = 0.1 * jax.random.normal(ks[10], (B, F), jnp.float32)
    rCS = 0.1 * jax.random.normal(ks[11], (B, F), jnp.float32)
    xs = jax.random.normal(ks[12], (T, B, F), jnp.float32)

    prepared = dkfn_prepare_params(A_stack, W_stack, Wg, bg, rWg, rbg, nw,
                                   K=K, F=F, B=B)

    # ---- 1) single-step forward() vs. pure-JAX reference -------------------
    refs = dkfn_reference(x, H, CS, rH, rCS,
                          A_stack, W_stack, Wg, bg, rWg, rbg, nw, cparam, K, F)
    outs = jax.block_until_ready(
        dkfn_forward(x, H, CS, rH, rCS, prepared, cparam, K=K, F=F))
    for got, want in zip(outs, refs):
        assert got.shape == want.shape and got.dtype == want.dtype
        assert jnp.allclose(got, want, rtol=3e-4, atol=1e-4), "forward mismatch"

    # ---- 2) fused T-step loop (states carried in VMEM) vs. step-by-step ref
    loop_out = jax.block_until_ready(dkfn_loop(xs, prepared, cparam, K=K, F=F))
    H_s = CS_s = rH_s = rCS_s = jnp.zeros((B, F), jnp.float32)
    for t in range(T):
        H_s, CS_s, gc_s, rH_s, rCS_s, pred_s = dkfn_reference(
            xs[t], H_s, CS_s, rH_s, rCS_s,
            A_stack, W_stack, Wg, bg, rWg, rbg, nw, cparam, K, F)
        got = _unpack(loop_out[t], K, F)
        want = (H_s, CS_s, gc_s, rH_s, rCS_s, pred_s)
        for g, w in zip(got, want):
            assert jnp.allclose(g, w, rtol=3e-4, atol=1e-4), f"loop mismatch @t={t}"

    # ---- 3) bf16 MXU-operand variant (v6e/v7x path), loose tolerance -------
    prepared_bf16 = dkfn_prepare_params(A_stack, W_stack, Wg, bg, rWg, rbg, nw,
                                        K=K, F=F, B=B, mxu_dtype=jnp.bfloat16)
    outs_bf16 = jax.block_until_ready(
        dkfn_forward(x, H, CS, rH, rCS, prepared_bf16, cparam, K=K, F=F))
    for got, want in zip(outs_bf16, refs):
        assert bool(jnp.all(jnp.isfinite(got)))
        assert jnp.allclose(got, want, rtol=1e-1, atol=3e-2), "bf16 variant mismatch"

    print("KERNEL_OK")
</pallas_src>

<mosaic_0001>
module attributes {stable_mosaic.version = 11 : i64} {
  func.func @dkfn_kernel(%arg0: i32, %arg1: memref<1x8x16xf32, #tpu.memory_space<vmem>>, %arg2: memref<8x16xf32, #tpu.memory_space<vmem>>, %arg3: memref<8x16xf32, #tpu.memory_space<vmem>>, %arg4: memref<8x16xf32, #tpu.memory_space<vmem>>, %arg5: memref<8x16xf32, #tpu.memory_space<vmem>>, %arg6: memref<16x48xf32, #tpu.memory_space<vmem>>, %arg7: memref<96x128xf32, #tpu.memory_space<vmem>>, %arg8: memref<8x128xf32, #tpu.memory_space<vmem>>, %arg9: memref<8x16xf32, #tpu.memory_space<vmem>>, %arg10: memref<1x1xf32, #tpu.memory_space<smem>>, %arg11: memref<1x8x128xf32, #tpu.memory_space<vmem>>, %arg12: memref<8x16xf32, #tpu.memory_space<vmem>>, %arg13: memref<8x16xf32, #tpu.memory_space<vmem>>, %arg14: memref<8x16xf32, #tpu.memory_space<vmem>>, %arg15: memref<8x16xf32, #tpu.memory_space<vmem>>, %arg16: memref<8x96xf32, #tpu.memory_space<vmem>>) attributes {dimension_semantics = [#tpu.dimension_semantics<arbitrary>], iteration_bounds = array<i64: 1>, scalar_prefetch = 0 : i64, scratch_operands = 5 : i64, tpu.core_type = #tpu.core_type<tc>, window_params = [{transform_indices = @transform_0, window_bounds = array<i64: 1, 8, 16>}, {pipeline_mode = #tpu.pipeline_mode<synchronous>, transform_indices = @transform_1, window_bounds = array<i64: 8, 16>}, {pipeline_mode = #tpu.pipeline_mode<synchronous>, transform_indices = @transform_2, window_bounds = array<i64: 8, 16>}, {pipeline_mode = #tpu.pipeline_mode<synchronous>, transform_indices = @transform_3, window_bounds = array<i64: 8, 16>}, {pipeline_mode = #tpu.pipeline_mode<synchronous>, transform_indices = @transform_4, window_bounds = array<i64: 8, 16>}, {pipeline_mode = #tpu.pipeline_mode<synchronous>, transform_indices = @transform_5, window_bounds = array<i64: 16, 48>}, {pipeline_mode = #tpu.pipeline_mode<synchronous>, transform_indices = @transform_6, window_bounds = array<i64: 96, 128>}, {pipeline_mode = #tpu.pipeline_mode<synchronous>, transform_indices = @transform_7, window_bounds = array<i64: 8, 128>}, {pipeline_mode = #tpu.pipeline_mode<synchronous>, transform_indices = @transform_8, window_bounds = array<i64: 8, 16>}, {transform_indices = @transform_9, window_bounds = array<i64: 1, 1>}, {transform_indices = @transform_10, window_bounds = array<i64: 1, 8, 128>}]} {
    %c0_i32 = arith.constant 0 : i32
    %0 = arith.cmpi eq, %arg0, %c0_i32 : i32
    %1 = arith.extui %0 : i1 to i32
    %c0_i32_0 = arith.constant 0 : i32
    %2 = arith.cmpi ne, %1, %c0_i32_0 : i32
    scf.if %2 {
      %c0_62 = arith.constant 0 : index
      %c0_63 = arith.constant 0 : index
      %116 = vector.load %arg2[%c0_62, %c0_63] : memref<8x16xf32, #tpu.memory_space<vmem>>, vector<8x16xf32>
      %c0_64 = arith.constant 0 : index
      %c0_65 = arith.constant 0 : index
      %117 = vector.load %arg12[%c0_64, %c0_65] : memref<8x16xf32, #tpu.memory_space<vmem>>, vector<8x16xf32>
      tpu.vector_store %arg12[%c0_64, %c0_65], %116 {strides = array<i32>} : memref<8x16xf32, #tpu.memory_space<vmem>>, vector<8x16xf32>,
      %c0_66 = arith.constant 0 : index
      %c0_67 = arith.constant 0 : index
      %118 = vector.load %arg3[%c0_66, %c0_67] : memref<8x16xf32, #tpu.memory_space<vmem>>, vector<8x16xf32>
      %c0_68 = arith.constant 0 : index
      %c0_69 = arith.constant 0 : index
      %119 = vector.load %arg13[%c0_68, %c0_69] : memref<8x16xf32, #tpu.memory_space<vmem>>, vector<8x16xf32>
      tpu.vector_store %arg13[%c0_68, %c0_69], %118 {strides = array<i32>} : memref<8x16xf32, #tpu.memory_space<vmem>>, vector<8x16xf32>,
      %c0_70 = arith.constant 0 : index
      %c0_71 = arith.constant 0 : index
      %120 = vector.load %arg4[%c0_70, %c0_71] : memref<8x16xf32, #tpu.memory_space<vmem>>, vector<8x16xf32>
      %c0_72 = arith.constant 0 : index
      %c0_73 = arith.constant 0 : index
      %121 = vector.load %arg14[%c0_72, %c0_73] : memref<8x16xf32, #tpu.memory_space<vmem>>, vector<8x16xf32>
      tpu.vector_store %arg14[%c0_72, %c0_73], %120 {strides = array<i32>} : memref<8x16xf32, #tpu.memory_space<vmem>>, vector<8x16xf32>,
      %c0_74 = arith.constant 0 : index
      %c0_75 = arith.constant 0 : index
      %122 = vector.load %arg5[%c0_74, %c0_75] : memref<8x16xf32, #tpu.memory_space<vmem>>, vector<8x16xf32>
      %c0_76 = arith.constant 0 : index
      %c0_77 = arith.constant 0 : index
      %123 = vector.load %arg15[%c0_76, %c0_77] : memref<8x16xf32, #tpu.memory_space<vmem>>, vector<8x16xf32>
      tpu.vector_store %arg15[%c0_76, %c0_77], %122 {strides = array<i32>} : memref<8x16xf32, #tpu.memory_space<vmem>>, vector<8x16xf32>,
    } else {
    }
    %c0 = arith.constant 0 : index
    %c0_1 = arith.constant 0 : index
    %c0_2 = arith.constant 0 : index
    %3 = vector.load %arg1[%c0, %c0_1, %c0_2] : memref<1x8x16xf32, #tpu.memory_space<vmem>>, vector<1x8x16xf32>
    %4 = vector.shape_cast %3 : vector<1x8x16xf32> to vector<8x16xf32>
    %c0_3 = arith.constant 0 : index
    %c0_4 = arith.constant 0 : index
    %5 = vector.load %arg12[%c0_3, %c0_4] : memref<8x16xf32, #tpu.memory_space<vmem>>, vector<8x16xf32>
    %c0_5 = arith.constant 0 : index
    %c0_6 = arith.constant 0 : index
    %6 = vector.load %arg13[%c0_5, %c0_6] : memref<8x16xf32, #tpu.memory_space<vmem>>, vector<8x16xf32>
    %c0_7 = arith.constant 0 : index
    %c0_8 = arith.constant 0 : index
    %7 = vector.load %arg14[%c0_7, %c0_8] : memref<8x16xf32, #tpu.memory_space<vmem>>, vector<8x16xf32>
    %c0_9 = arith.constant 0 : index
    %c0_10 = arith.constant 0 : index
    %8 = vector.load %arg15[%c0_9, %c0_10] : memref<8x16xf32, #tpu.memory_space<vmem>>, vector<8x16xf32>
    %c0_11 = arith.constant 0 : index
    %c0_12 = arith.constant 0 : index
    %9 = vector.load %arg6[%c0_11, %c0_12] : memref<16x48xf32, #tpu.memory_space<vmem>>, vector<16x48xf32>
    %cst = arith.constant dense<0.000000e+00> : vector<8x48xf32>
    %10 = tpu.matmul %4, %9, %cst {dimension_numbers = #tpu.dot_dimension_numbers<[1], [0], [0], [1], [0, 0, 1, 1], [], []>} : vector<8x16xf32>, vector<16x48xf32>, vector<8x48xf32> -> vector<8x48xf32>
    %c0_13 = arith.constant 0 : index
    %c0_14 = arith.constant 0 : index
    %11 = vector.load %arg16[%c0_13, %c0_14] : memref<8x96xf32, #tpu.memory_space<vmem>>, vector<8x16xf32>
    tpu.vector_store %arg16[%c0_13, %c0_14], %4 {strides = array<i32>} : memref<8x96xf32, #tpu.memory_space<vmem>>, vector<8x16xf32>,
    %c0_15 = arith.constant 0 : index
    %c16 = arith.constant 16 : index
    %12 = vector.load %arg16[%c0_15, %c16] : memref<8x96xf32, #tpu.memory_space<vmem>>, vector<8x48xf32>
    tpu.vector_store %arg16[%c0_15, %c16], %10 {strides = array<i32>} : memref<8x96xf32, #tpu.memory_space<vmem>>, vector<8x48xf32>,
    %c0_16 = arith.constant 0 : index
    %c64 = arith.constant 64 : index
    %13 = vector.load %arg16[%c0_16, %c64] : memref<8x96xf32, #tpu.memory_space<vmem>>, vector<8x16xf32>
    tpu.vector_store %arg16[%c0_16, %c64], %5 {strides = array<i32>} : memref<8x96xf32, #tpu.memory_space<vmem>>, vector<8x16xf32>,
    %c0_17 = arith.constant 0 : index
    %c80 = arith.constant 80 : index
    %14 = vector.load %arg16[%c0_17, %c80] : memref<8x96xf32, #tpu.memory_space<vmem>>, vector<8x16xf32>
    tpu.vector_store %arg16[%c0_17, %c80], %7 {strides = array<i32>} : memref<8x96xf32, #tpu.memory_space<vmem>>, vector<8x16xf32>,
    %c0_18 = arith.constant 0 : index
    %c0_19 = arith.constant 0 : index
    %15 = vector.load %arg16[%c0_18, %c0_19] : memref<8x96xf32, #tpu.memory_space<vmem>>, vector<8x96xf32>
    %c0_20 = arith.constant 0 : index
    %c0_21 = arith.constant 0 : index
    %16 = vector.load %arg7[%c0_20, %c0_21] : memref<96x128xf32, #tpu.memory_space<vmem>>, vector<96x128xf32>
    %cst_22 = arith.constant dense<0.000000e+00> : vector<8x128xf32>
    %17 = tpu.matmul %15, %16, %cst_22 {dimension_numbers = #tpu.dot_dimension_numbers<[1], [0], [0], [1], [0, 0, 1, 1], [], []>} : vector<8x96xf32>, vector<96x128xf32>, vector<8x128xf32> -> vector<8x128xf32>
    %c0_23 = arith.constant 0 : index
    %c0_24 = arith.constant 0 : index
    %18 = vector.load %arg8[%c0_23, %c0_24] : memref<8x128xf32, #tpu.memory_space<vmem>>, vector<8x128xf32>
    %19 = arith.addf %17, %18 : vector<8x128xf32>
    %20 = tpu.iota {dimensions = array<i32: 1>} : vector<8x128xi32>
    %c48_i32 = arith.constant 48 : i32
    %21 = vector.broadcast %c48_i32 : i32 to vector<8x128xi32>
    %22 = arith.cmpi sge, %20, %21 : vector<8x128xi32>
    %c64_i32 = arith.constant 64 : i32
    %23 = vector.broadcast %c64_i32 : i32 to vector<8x128xi32>
    %24 = arith.cmpi slt, %20, %23 : vector<8x128xi32>
    %25 = arith.andi %22, %24 : vector<8x128xi1>
    %c112_i32 = arith.constant 112 : i32
    %26 = vector.broadcast %c112_i32 : i32 to vector<8x128xi32>
    %27 = arith.cmpi sge, %20, %26 : vector<8x128xi32>
    %28 = arith.ori %25, %27 : vector<8x128xi1>
    %29 = math.tanh %19 : vector<8x128xf32>
    %30 = arith.negf %19 : vector<8x128xf32>
    %31 = math.exp %30 : vector<8x128xf32>
    %cst_25 = arith.constant 1.000000e+00 : f32
    %32 = vector.broadcast %cst_25 : f32 to vector<8x128xf32>
    %33 = arith.addf %32, %31 : vector<8x128xf32>
    %34 = arith.divf %32, %33 : vector<8x128xf32>
    %35 = arith.select %28, %29, %34 : vector<8x128xi1>, vector<8x128xf32>
    %36 = vector.extract_strided_slice %35 {offsets = [0, 0], sizes = [8, 16], strides = [1, 1]} : vector<8x128xf32> to vector<8x16xf32>
    %37 = vector.extract_strided_slice %35 {offsets = [0, 16], sizes = [8, 16], strides = [1, 1]} : vector<8x128xf32> to vector<8x16xf32>
    %38 = vector.extract_strided_slice %35 {offsets = [0, 32], sizes = [8, 16], strides = [1, 1]} : vector<8x128xf32> to vector<8x16xf32>
    %39 = vector.extract_strided_slice %35 {offsets = [0, 48], sizes = [8, 16], strides = [1, 1]} : vector<8x128xf32> to vector<8x16xf32>
    %40 = vector.extract_strided_slice %35 {offsets = [0, 64], sizes = [8, 16], strides = [1, 1]} : vector<8x128xf32> to vector<8x16xf32>
    %41 = vector.extract_strided_slice %35 {offsets = [0, 80], sizes = [8, 16], strides = [1, 1]} : vector<8x128xf32> to vector<8x16xf32>
    %42 = vector.extract_strided_slice %35 {offsets = [0, 96], sizes = [8, 16], strides = [1, 1]} : vector<8x128xf32> to vector<8x16xf32>
    %43 = vector.extract_strided_slice %35 {offsets = [0, 112], sizes = [8, 16], strides = [1, 1]} : vector<8x128xf32> to vector<8x16xf32>
    %c0_26 = arith.constant 0 : index
    %c0_27 = arith.constant 0 : index
    %44 = vector.load %arg9[%c0_26, %c0_27] : memref<8x16xf32, #tpu.memory_space<vmem>>, vector<8x16xf32>
    %45 = arith.mulf %6, %44 : vector<8x16xf32>
    %46 = arith.mulf %36, %45 : vector<8x16xf32>
    %47 = arith.mulf %37, %39 : vector<8x16xf32>
    %48 = arith.addf %46, %47 : vector<8x16xf32>
    %49 = math.tanh %48 : vector<8x16xf32>
    %50 = arith.mulf %38, %49 : vector<8x16xf32>
    %51 = arith.mulf %40, %8 : vector<8x16xf32>
    %52 = arith.mulf %41, %43 : vector<8x16xf32>
    %53 = arith.addf %51, %52 : vector<8x16xf32>
    %54 = math.tanh %53 : vector<8x16xf32>
    %55 = arith.mulf %42, %54 : vector<8x16xf32>
    %56 = vector.shape_cast %4 : vector<8x16xf32> to vector<1x8x16xf32>
    %cst_28 = arith.constant dense<0.000000e+00> : vector<1xf32>
    %57 = vector.multi_reduction <add>, %56, %cst_28 [1, 2] : vector<1x8x16xf32> to vector<1xf32>
    %58 = vector.shape_cast %57 : vector<1xf32> to vector<1x1x1xf32>
    %59 = vector.extract %58[0, 0, 0] : f32 from vector<1x1x1xf32>
    %cst_29 = arith.constant 7.812500e-03 : f32
    %60 = arith.mulf %59, %cst_29 : f32
    %61 = vector.broadcast %60 : f32 to vector<8x16xf32>
    %62 = arith.subf %4, %61 : vector<8x16xf32>
    %63 = arith.mulf %62, %62 : vector<8x16xf32>
    %64 = vector.shape_cast %63 : vector<8x16xf32> to vector<1x8x16xf32>
    %cst_30 = arith.constant dense<0.000000e+00> : vector<1xf32>
    %65 = vector.multi_reduction <add>, %64, %cst_30 [1, 2] : vector<1x8x16xf32> to vector<1xf32>
    %66 = vector.shape_cast %65 : vector<1xf32> to vector<1x1x1xf32>
    %67 = vector.extract %66[0, 0, 0] : f32 from vector<1x1x1xf32>
    %cst_31 = arith.constant 0.00787401571 : f32
    %68 = arith.mulf %67, %cst_31 : f32
    %69 = vector.shape_cast %10 : vector<8x48xf32> to vector<1x8x48xf32>
    %cst_32 = arith.constant dense<0.000000e+00> : vector<1xf32>
    %70 = vector.multi_reduction <add>, %69, %cst_32 [1, 2] : vector<1x8x48xf32> to vector<1xf32>
    %71 = vector.shape_cast %70 : vector<1xf32> to vector<1x1x1xf32>
    %72 = vector.extract %71[0, 0, 0] : f32 from vector<1x1x1xf32>
    %cst_33 = arith.constant 0.00260416674 : f32
    %73 = arith.mulf %72, %cst_33 : f32
    %74 = vector.broadcast %73 : f32 to vector<8x48xf32>
    %75 = arith.subf %10, %74 : vector<8x48xf32>
    %76 = arith.mulf %75, %75 : vector<8x48xf32>
    %77 = vector.shape_cast %76 : vector<8x48xf32> to vector<1x8x48xf32>
    %cst_34 = arith.constant dense<0.000000e+00> : vector<1xf32>
    %78 = vector.multi_reduction <add>, %77, %cst_34 [1, 2] : vector<1x8x48xf32> to vector<1xf32>
    %79 = vector.shape_cast %78 : vector<1xf32> to vector<1x1x1xf32>
    %80 = vector.extract %79[0, 0, 0] : f32 from vector<1x1x1xf32>
    %cst_35 = arith.constant 0.0026109661 : f32
    %81 = arith.mulf %80, %cst_35 : f32
    %c0_36 = arith.constant 0 : index
    %c0_37 = arith.constant 0 : index
    %82 = memref.load %arg10[%c0_36, %c0_37] : memref<1x1xf32, #tpu.memory_space<smem>>
    %83 = arith.mulf %81, %82 : f32
    %84 = arith.addf %68, %83 : f32
    %cst_38 = arith.constant 1.000000e+00 : f32
    %85 = arith.divf %cst_38, %84 : f32
    %86 = arith.mulf %68, %82 : f32
    %87 = vector.broadcast %86 : f32 to vector<8x16xf32>
    %88 = arith.mulf %50, %87 : vector<8x16xf32>
    %89 = vector.broadcast %81 : f32 to vector<8x16xf32>
    %90 = arith.mulf %55, %89 : vector<8x16xf32>
    %91 = arith.addf %88, %90 : vector<8x16xf32>
    %92 = vector.broadcast %85 : f32 to vector<8x16xf32>
    %93 = arith.mulf %91, %92 : vector<8x16xf32>
    %c0_39 = arith.constant 0 : index
    %c0_40 = arith.constant 0 : index
    %94 = vector.load %arg12[%c0_39, %c0_40] : memref<8x16xf32, #tpu.memory_space<vmem>>, vector<8x16xf32>
    tpu.vector_store %arg12[%c0_39, %c0_40], %50 {strides = array<i32>} : memref<8x16xf32, #tpu.memory_space<vmem>>, vector<8x16xf32>,
    %c0_41 = arith.constant 0 : index
    %c0_42 = arith.constant 0 : index
    %95 = vector.load %arg13[%c0_41, %c0_42] : memref<8x16xf32, #tpu.memory_space<vmem>>, vector<8x16xf32>
    tpu.vector_store %arg13[%c0_41, %c0_42], %48 {strides = array<i32>} : memref<8x16xf32, #tpu.memory_space<vmem>>, vector<8x16xf32>,
    %c0_43 = arith.constant 0 : index
    %c0_44 = arith.constant 0 : index
    %96 = vector.load %arg14[%c0_43, %c0_44] : memref<8x16xf32, #tpu.memory_space<vmem>>, vector<8x16xf32>
    tpu.vector_store %arg14[%c0_43, %c0_44], %55 {strides = array<i32>} : memref<8x16xf32, #tpu.memory_space<vmem>>, vector<8x16xf32>,
    %c0_45 = arith.constant 0 : index
    %c0_46 = arith.constant 0 : index
    %97 = vector.load %arg15[%c0_45, %c0_46] : memref<8x16xf32, #tpu.memory_space<vmem>>, vector<8x16xf32>
    tpu.vector_store %arg15[%c0_45, %c0_46], %53 {strides = array<i32>} : memref<8x16xf32, #tpu.memory_space<vmem>>, vector<8x16xf32>,
    %c0_47 = arith.constant 0 : index
    %c0_48 = arith.constant 0 : index
    %c0_49 = arith.constant 0 : index
    %98 = vector.load %arg11[%c0_47, %c0_48, %c0_49] : memref<1x8x128xf32, #tpu.memory_space<vmem>>, vector<1x8x48xf32>
    %99 = vector.shape_cast %98 : vector<1x8x48xf32> to vector<8x48xf32>
    %100 = vector.shape_cast %10 : vector<8x48xf32> to vector<1x8x48xf32>
    tpu.vector_store %arg11[%c0_47, %c0_48, %c0_49], %100 {strides = array<i32>} : memref<1x8x128xf32, #tpu.memory_space<vmem>>, vector<1x8x48xf32>,
    %c0_50 = arith.constant 0 : index
    %c0_51 = arith.constant 0 : index
    %c48 = arith.constant 48 : index
    %101 = vector.load %arg11[%c0_50, %c0_51, %c48] : memref<1x8x128xf32, #tpu.memory_space<vmem>>, vector<1x8x16xf32>
    %102 = vector.shape_cast %101 : vector<1x8x16xf32> to vector<8x16xf32>
    %103 = vector.shape_cast %50 : vector<8x16xf32> to vector<1x8x16xf32>
    tpu.vector_store %arg11[%c0_50, %c0_51, %c48], %103 {strides = array<i32>} : memref<1x8x128xf32, #tpu.memory_space<vmem>>, vector<1x8x16xf32>,
    %c0_52 = arith.constant 0 : index
    %c0_53 = arith.constant 0 : index
    %c64_54 = arith.constant 64 : index
    %104 = vector.load %arg11[%c0_52, %c0_53, %c64_54] : memref<1x8x128xf32, #tpu.memory_space<vmem>>, vector<1x8x16xf32>
    %105 = vector.shape_cast %104 : vector<1x8x16xf32> to vector<8x16xf32>
    %106 = vector.shape_cast %48 : vector<8x16xf32> to vector<1x8x16xf32>
    tpu.vector_store %arg11[%c0_52, %c0_53, %c64_54], %106 {strides = array<i32>} : memref<1x8x128xf32, #tpu.memory_space<vmem>>, vector<1x8x16xf32>,
    %c0_55 = arith.constant 0 : index
    %c0_56 = arith.constant 0 : index
    %c80_57 = arith.constant 80 : index
    %107 = vector.load %arg11[%c0_55, %c0_56, %c80_57] : memref<1x8x128xf32, #tpu.memory_space<vmem>>, vector<1x8x16xf32>
    %108 = vector.shape_cast %107 : vector<1x8x16xf32> to vector<8x16xf32>
    %109 = vector.shape_cast %55 : vector<8x16xf32> to vector<1x8x16xf32>
    tpu.vector_store %arg11[%c0_55, %c0_56, %c80_57], %109 {strides = array<i32>} : memref<1x8x128xf32, #tpu.memory_space<vmem>>, vector<1x8x16xf32>,
    %c0_58 = arith.constant 0 : index
    %c0_59 = arith.constant 0 : index
    %c96 = arith.constant 96 : index
    %110 = vector.load %arg11[%c0_58, %c0_59, %c96] : memref<1x8x128xf32, #tpu.memory_space<vmem>>, vector<1x8x16xf32>
    %111 = vector.shape_cast %110 : vector<1x8x16xf32> to vector<8x16xf32>
    %112 = vector.shape_cast %53 : vector<8x16xf32> to vector<1x8x16xf32>
    tpu.vector_store %arg11[%c0_58, %c0_59, %c96], %112 {strides = array<i32>} : memref<1x8x128xf32, #tpu.memory_space<vmem>>, vector<1x8x16xf32>,
    %c0_60 = arith.constant 0 : index
    %c0_61 = arith.constant 0 : index
    %c112 = arith.constant 112 : index
    %113 = vector.load %arg11[%c0_60, %c0_61, %c112] : memref<1x8x128xf32, #tpu.memory_space<vmem>>, vector<1x8x16xf32>
    %114 = vector.shape_cast %113 : vector<1x8x16xf32> to vector<8x16xf32>
    %115 = vector.shape_cast %93 : vector<8x16xf32> to vector<1x8x16xf32>
    tpu.vector_store %arg11[%c0_60, %c0_61, %c112], %115 {strides = array<i32>} : memref<1x8x128xf32, #tpu.memory_space<vmem>>, vector<1x8x16xf32>,
    return
  }
  func.func @transform_0(%arg0: i32) -> (i32, i32, i32) {
    %c0_i32 = arith.constant 0 : i32
    %c0_i32_0 = arith.constant 0 : i32
    %c0_i32_1 = arith.constant 0 : i32
    return %arg0, %c0_i32, %c0_i32_0 : i32, i32, i32
  }
  func.func @transform_1(%arg0: i32) -> (i32, i32) {
    %c0_i32 = arith.constant 0 : i32
    %c0_i32_0 = arith.constant 0 : i32
    %c0_i32_1 = arith.constant 0 : i32
    return %c0_i32, %c0_i32_0 : i32, i32
  }
  func.func @transform_2(%arg0: i32) -> (i32, i32) {
    %c0_i32 = arith.constant 0 : i32
    %c0_i32_0 = arith.constant 0 : i32
    %c0_i32_1 = arith.constant 0 : i32
    return %c0_i32, %c0_i32_0 : i32, i32
  }
  func.func @transform_3(%arg0: i32) -> (i32, i32) {
    %c0_i32 = arith.constant 0 : i32
    %c0_i32_0 = arith.constant 0 : i32
    %c0_i32_1 = arith.constant 0 : i32
    return %c0_i32, %c0_i32_0 : i32, i32
  }
  func.func @transform_4(%arg0: i32) -> (i32, i32) {
    %c0_i32 = arith.constant 0 : i32
    %c0_i32_0 = arith.constant 0 : i32
    %c0_i32_1 = arith.constant 0 : i32
    return %c0_i32, %c0_i32_0 : i32, i32
  }
  func.func @transform_5(%arg0: i32) -> (i32, i32) {
    %c0_i32 = arith.constant 0 : i32
    %c0_i32_0 = arith.constant 0 : i32
    %c0_i32_1 = arith.constant 0 : i32
    return %c0_i32, %c0_i32_0 : i32, i32
  }
  func.func @transform_6(%arg0: i32) -> (i32, i32) {
    %c0_i32 = arith.constant 0 : i32
    %c0_i32_0 = arith.constant 0 : i32
    %c0_i32_1 = arith.constant 0 : i32
    return %c0_i32, %c0_i32_0 : i32, i32
  }
  func.func @transform_7(%arg0: i32) -> (i32, i32) {
    %c0_i32 = arith.constant 0 : i32
    %c0_i32_0 = arith.constant 0 : i32
    %c0_i32_1 = arith.constant 0 : i32
    return %c0_i32, %c0_i32_0 : i32, i32
  }
  func.func @transform_8(%arg0: i32) -> (i32, i32) {
    %c0_i32 = arith.constant 0 : i32
    %c0_i32_0 = arith.constant 0 : i32
    %c0_i32_1 = arith.constant 0 : i32
    return %c0_i32, %c0_i32_0 : i32, i32
  }
  func.func @transform_9(%arg0: i32) -> (i32, i32) {
    %c0_i32 = arith.constant 0 : i32
    %c0_i32_0 = arith.constant 0 : i32
    %c0_i32_1 = arith.constant 0 : i32
    return %c0_i32, %c0_i32_0 : i32, i32
  }
  func.func @transform_10(%arg0: i32) -> (i32, i32, i32) {
    %c0_i32 = arith.constant 0 : i32
    %c0_i32_0 = arith.constant 0 : i32
    %c0_i32_1 = arith.constant 0 : i32
    return %arg0, %c0_i32, %c0_i32_0 : i32, i32, i32
  }
}

</mosaic_0001>

<bundles_post_ra>
// kernel: tpu_custom_call.1
= control target key start
LH: loop header
LB: loop body
LE: loop exit
PB: predicated region body
PF: predicated region fallthrough
CT: control target
= control target key end

     0   :  { %16 = vsyncpa [#allocation9], 0  ;;  %s999_s0 = inlined_call_operand.hbm [shape: f32[1,8,16], index: 0, kind: input, shape index: {}]   ;;  %s1000_s1 = inlined_call_operand.hbm [shape: f32[8,16], index: 1, kind: input, shape index: {}]   ;;  %s1001_s2 = inlined_call_operand.hbm [shape: f32[8,16], index: 2, kind: input, shape index: {}]   ;;  %s1002_s3 = inlined_call_operand.hbm [shape: f32[8,16], index: 3, kind: input, shape index: {}]   ;;  %s1003_s4 = inlined_call_operand.hbm [shape: f32[8,16], index: 4, kind: input, shape index: {}]   ;;  %s1004_s5 = inlined_call_operand.vmem [shape: f32[16,48], index: 5, kind: input, shape index: {}]   ;;  %s1005_s6 = inlined_call_operand.hbm [shape: f32[96,128], index: 6, kind: input, shape index: {}]   ;;  %s1006_s7 = inlined_call_operand.vmem [shape: f32[8,128], index: 7, kind: input, shape index: {}]   ;;  %s1007_s8 = inlined_call_operand.vmem [shape: f32[8,16], index: 8, kind: input, shape index: {}]   ;;  %s1008_s9 = inlined_call_operand.<no memory space> [shape: f32[1,1], index: 9, kind: input, shape index: {}]   ;;  %s1009_s10 = inlined_call_operand.hbm [shape: f32[1,8,128], index: 10, kind: output, shape index: {}]  }
   0x1   :  { %17 = vsyncpa [#allocation12], 0 }
   0x2   :  { %18 = vsyncpa [#allocation15], 0 }
   0x3   :  { %19 = vsyncpa [#allocation18], 0 }
   0x4   :  { %20 = vsyncpa [#allocation10], 0  ;;  %s763_s13 = smov [#allocation11]   ;;  %s764_s15 = smov [#allocation14]  }
   0x5   :  { %s37_s14 = sshll.u32 %s763_s13, 4  ;;  %s57_s16 = sshll.u32 %s764_s15, 4  ;;  %s38_s14 = int_to_ptr.vmem [resolvable:$true] %s37_s14  ;;  %s58_s16 = int_to_ptr.vmem [resolvable:$true] %s57_s16 }
   0x6   :  { %s599_s19 = scalar_lea.hbm %s1000_s1, 128 }
   0x7   :  { %p600_p0 = scmp.ne.s32.totalorder %s1000_s1, %s599_s19  ;;  %p603_p1 = scmp.lt.u32.totalorder %s599_s19, %s1000_s1 }
   0x9   :  { %p605_p2 = pnand %p603_p1, %p600_p0 }
   0xb   :  { %608 = shalt.err (!%p605_p2)
}
   0xc   :  { %s609_s24 = scalar_lea.vmem %s38_s14, 128  ;;  %p614_p4 = scmp.lt.s32.totalorder %s38_s14, %s38_s14 }
   0xd   :  { %p610_p3 = scmp.ne.s32.totalorder %s38_s14, %s609_s24  ;;  %p615_p5 = scmp.lt.s32.totalorder %s609_s24, %s609_s24 }
   0xf   :  { %p616_p6 = por %p615_p5, %p614_p4 }
  0x11   :  { %p617_p7 = pnand %p616_p6, %p610_p3 }
  0x13   :  { %620 = shalt.err (!%p617_p7)
}
  0x14   :  { %40 = dma.hbm_to_vmem [thread:$0]  %s1000_s1, 128, %s38_s14, [#allocation12]  }
  0x15   :  { %s621_s29 = scalar_lea.hbm %s1002_s3, 128 }
  0x16   :  { %p622_p8 = scmp.ne.s32.totalorder %s1002_s3, %s621_s29  ;;  %p625_p9 = scmp.lt.u32.totalorder %s621_s29, %s1002_s3 }
  0x18   :  { %p627_p10 = pnand %p625_p9, %p622_p8 }
  0x1a   :  { %630 = shalt.err (!%p627_p10)
}
  0x1b   :  { %s631_s15 = scalar_lea.vmem %s58_s16, 128  ;;  %p636_p12 = scmp.lt.s32.totalorder %s58_s16, %s58_s16 }
  0x1c   :  { %p632_p11 = scmp.ne.s32.totalorder %s58_s16, %s631_s15  ;;  %p637_p13 = scmp.lt.s32.totalorder %s631_s15, %s631_s15 }
  0x1e   :  { %p638_p0 = por %p637_p13, %p636_p12 }
  0x20   :  { %p639_p1 = pnand %p638_p0, %p632_p11 }
  0x22   :  { %642 = shalt.err (!%p639_p1)
}
  0x23   :  { %60 = dma.hbm_to_vmem [thread:$0]  %s1002_s3, 128, %s58_s16, [#allocation15]  }
  0x24   :  { %s765_s17 = smov [#allocation8]   ;;  %s766_s19 = smov [#allocation13]  }
  0x25   :  { %s27_s18 = sshll.u32 %s765_s17, 4  ;;  %s47_s20 = sshll.u32 %s766_s19, 4  ;;  %s28_s18 = int_to_ptr.vmem [resolvable:$true] %s27_s18  ;;  %s48_s20 = int_to_ptr.vmem [resolvable:$true] %s47_s20 }
  0x26   :  { %s643_s23 = scalar_lea.hbm %s999_s0, 128 }
  0x27   :  { %p644_p2 = scmp.ne.s32.totalorder %s999_s0, %s643_s23  ;;  %p647_p3 = scmp.lt.u32.totalorder %s643_s23, %s999_s0 }
  0x29   :  { %p649_p4 = pnand %p647_p3, %p644_p2 }
  0x2b   :  { %652 = shalt.err (!%p649_p4)
}
  0x2c   :  { %s653_s3 = scalar_lea.vmem %s28_s18, 128  ;;  %p658_p6 = scmp.lt.s32.totalorder %s28_s18, %s28_s18 }
  0x2d   :  { %p654_p5 = scmp.ne.s32.totalorder %s28_s18, %s653_s3  ;;  %p659_p7 = scmp.lt.s32.totalorder %s653_s3, %s653_s3 }
  0x2f   :  { %p660_p8 = por %p659_p7, %p658_p6 }
  0x31   :  { %p661_p9 = pnand %p660_p8, %p654_p5 }
  0x33   :  { %664 = shalt.err (!%p661_p9)
}
  0x34   :  { %30 = dma.hbm_to_vmem [thread:$0]  %s999_s0, 128, %s28_s18, [#allocation9]  }
  0x35   :  { %s665_s11 = scalar_lea.hbm %s1001_s2, 128 }
  0x36   :  { %p666_p10 = scmp.ne.s32.totalorder %s1001_s2, %s665_s11  ;;  %p669_p11 = scmp.lt.u32.totalorder %s665_s11, %s1001_s2 }
  0x38   :  { %p671_p12 = pnand %p669_p11, %p666_p10 }
  0x3a   :  { %674 = shalt.err (!%p671_p12)
}
  0x3b   :  { %s675_s14 = scalar_lea.vmem %s48_s20, 128  ;;  %p680_p0 = scmp.lt.s32.totalorder %s48_s20, %s48_s20 }
  0x3c   :  { %p676_p13 = scmp.ne.s32.totalorder %s48_s20, %s675_s14  ;;  %p681_p1 = scmp.lt.s32.totalorder %s675_s14, %s675_s14 }
  0x3e   :  { %p682_p2 = por %p681_p1, %p680_p0 }
  0x40   :  { %p683_p3 = pnand %p682_p2, %p676_p13 }
  0x42   :  { %686 = shalt.err (!%p683_p3)
}
  0x43   :  { %50 = dma.hbm_to_vmem [thread:$0]  %s1001_s2, 128, %s48_s20, [#allocation12]  }
  0x44   :  { %s767_s18 = smov [#allocation16]   ;;  %s768_s21 = smov [#allocation17]  }
  0x45   :  { %s67_s19 = sshll.u32 %s767_s18, 4  ;;  %s78_s22 = sshll.u32 %s768_s21, 4  ;;  %s68_s19 = int_to_ptr.vmem [resolvable:$true] %s67_s19  ;;  %s884_s22 = int_to_ptr.vmem [resolvable:$true] %s78_s22 }
  0x46   :  { %s687_s25 = scalar_lea.hbm %s1003_s4, 128 }
  0x47   :  { %p688_p4 = scmp.ne.s32.totalorder %s1003_s4, %s687_s25  ;;  %p691_p5 = scmp.lt.u32.totalorder %s687_s25, %s1003_s4 }
  0x49   :  { %p693_p6 = pnand %p691_p5, %p688_p4 }
  0x4b   :  { %696 = shalt.err (!%p693_p6)
}
  0x4c   :  { %s697_s2 = scalar_lea.vmem %s68_s19, 128  ;;  %p702_p8 = scmp.lt.s32.totalorder %s68_s19, %s68_s19 }
  0x4d   :  { %p698_p7 = scmp.ne.s32.totalorder %s68_s19, %s697_s2  ;;  %p703_p9 = scmp.lt.s32.totalorder %s697_s2, %s697_s2 }
  0x4f   :  { %p704_p10 = por %p703_p9, %p702_p8 }
  0x51   :  { %p705_p11 = pnand %p704_p10, %p698_p7 }
  0x53   :  { %708 = shalt.err (!%p705_p11)
}
  0x54   :  { %70 = dma.hbm_to_vmem [thread:$0]  %s1003_s4, 128, %s68_s19, [#allocation15]  }
  0x55   :  { %s709_s11 = scalar_lea.hbm %s1005_s6, 1536 }
  0x56   :  { %p710_p12 = scmp.ne.s32.totalorder %s1005_s6, %s709_s11  ;;  %p713_p13 = scmp.lt.u32.totalorder %s709_s11, %s1005_s6 }
  0x58   :  { %p715_p0 = pnand %p713_p13, %p710_p12 }
  0x5a   :  { %718 = shalt.err (!%p715_p0)
}
  0x5b   :  { %s719_s14 = scalar_lea.vmem %s884_s22, 1536  ;;  %p724_p2 = scmp.lt.s32.totalorder %s884_s22, %s884_s22 }
  0x5c   :  { %p720_p1 = scmp.ne.s32.totalorder %s884_s22, %s719_s14  ;;  %p725_p3 = scmp.lt.s32.totalorder %s719_s14, %s719_s14 }
  0x5e   :  { %p726_p4 = por %p725_p3, %p724_p2 }
  0x60   :  { %p727_p5 = pnand %p726_p4, %p720_p1 }
  0x62   :  { %730 = shalt.err (!%p727_p5)
}
  0x63   :  { %s769_s4 = smov 128   ;;  %s770_s0 = smov 8  }
  0x64   :  { %84 = dma.hbm_to_vmem [thread:$0]  %s1005_s6, 1536, %s884_s22, [#allocation18], %s769_s4, %s769_s4, %s770_s0  }
  0x65   :  { %753 = dma.done.wait [#allocation9], 128  }
  0x66   :  { %754 = vsyncadd [#allocation9], 4294967168 }
  0x67   :  { %755 = dma.done.wait [#allocation12], 256  }
  0x68   :  { %756 = vsyncadd [#allocation12], 4294967040 }
  0x69   :  { %757 = dma.done.wait [#allocation15], 256  }
  0x6a   :  { %758 = vsyncadd [#allocation15], 4294967040 }
  0x6b   :  { %759 = dma.done.wait [#allocation18], 1536  }
  0x6c   :  { %760 = vsyncadd [#allocation18], 4294965760  ;;  %v771_v0 = vmov 0.0|0.0   ;;  %vm772_vm0 = vmmov 0   ;;  %v773_v1 = vmov 0.0   ;;  %vm114_vm1 = vcmask 130048  }
  0x6d   :  { %538 = vmatprep.subr.bf16.mxu0 %v771_v0  ;;  %508 = vmatprep.mubr.msk.f32.mxu0 %vm772_vm0, %v773_v1  ;;  %v127_v2 = vld [vmem:[%s1004_s5] sm:$0xff]  ;;  %v128_v3 = vld [vmem:[%s1004_s5 + $0x8] sm:$0xff]  ;;  %s774_s23 = smov 80   ;;  %v113_v9 = vld [vmem:[#allocation11] sm:$0xff]  ;;  %vm381_vm2 = vcmask 392192   ;;  %s775_s5 = smov 16  }
  0x6e   :  { %541 = vmatprep.subr.bf16.mxu1 %v771_v0  ;;  %535 = vmatprep.mubr.msk.f32.mxu1 %vm772_vm0, %v773_v1  ;;  %v921_v4 = vld [vmem:[#allocation8] sm:$0xff]  ;;  %v539_v5 = vpack.c.bf16 %v128_v3, %v127_v2  ;;  %v118_v6 = vld [vmem:[#allocation14] sm:$0xff]  ;;  %115 = vst.msk [vmem:[#allocation2] sm:$0xff] %vm114_vm1, %v113_v9  ;;  %v223_v10 = vld [vmem:[#allocation17] sm:$0xff]  ;;  %s776_s24 = smov 64   ;;  %vm208_vm3 = vcmask 523392   ;;  %v310_v9 = vlaneseq }
  0x6f   :  { %203 = vst.msk [vmem:[#allocation6] sm:$0xff] %vm114_vm1, %v921_v4  ;;  %119 = vst.msk [vmem:[#allocation4] sm:$0xff] %vm114_vm1, %v118_v6  ;;  %v356_v8 = vsel %vm114_vm1, %v921_v4, 0.0  ;;  %v224_v11 = vld [vmem:[#allocation17 + $0x8] sm:$0xff]  ;;  %v225_v12 = vld [vmem:[#allocation17 + $0x10] sm:$0xff]  ;;  %vm214_vm4 = vcmask 654848  }
  0x70   :  { %540 = vmatpush3.bf16.msra.mxu0 %v539_v5  ;;  %v542_v13 = vpack.c.bf16 %v224_v11, %v223_v10  ;;  %v226_v14 = vld [vmem:[#allocation17 + $0x18] sm:$0xff]  ;;  %v227_v16 = vld [vmem:[#allocation17 + $0x20] sm:$0xff]  ;;  %v228_v17 = vld [vmem:[#allocation17 + $0x28] sm:$0xff]  ;;  %vm220_vm5 = vcmask 786048   ;;  %vm236_vm6 = vcmask 785408   ;;  %s778_s1 = smov 112  }
  0x71   :  { %v545_v15 = vpack.c.bf16 %v226_v14, %v225_v12  ;;  %v548_v18 = vpack.c.bf16 %v228_v17, %v227_v16  ;;  %v229_v27 = vld [vmem:[#allocation17 + $0x30] sm:$0xff]  ;;  %v230_v28 = vld [vmem:[#allocation17 + $0x38] sm:$0xff]  ;;  %v231_v30 = vld [vmem:[#allocation17 + $0x40] sm:$0xff]  ;;  %v311_v12 = vand.u32 127, %v310_v9  ;;  %s779_s0 = smov 32   ;;  %vm445_vm12 = vcmask 523648  }
  0x72   :  { %543 = vmatpush3.bf16.msra.mxu1 %v542_v13  ;;  %v551_v29 = vpack.c.bf16 %v230_v28, %v229_v27  ;;  %v232_v31 = vld [vmem:[#allocation17 + $0x48] sm:$0xff]  ;;  %v233_v33 = vld [vmem:[#allocation17 + $0x50] sm:$0xff]  ;;  %v234_v34 = vld [vmem:[#allocation17 + $0x58] sm:$0xff]  ;;  %vm459_vm13 = vcmask 917248   ;;  %vm465_vm14 = vcmask 1048448  }
  0x73   :  { %509 = vmatmul.mubr.msk.f32.vlgmr.msra.gmra.mrb[0].mxu0 %vm114_vm1, %v921_v4  ;;  %544 = vmatprep.subr.bf16.mxu1 %v771_v0  ;;  %v554_v32 = vpack.c.bf16 %v232_v31, %v231_v30  ;;  %v557_v35 = vpack.c.bf16 %v234_v34, %v233_v33  ;;  %v120_v47 = vld [vmem:[#allocation16] sm:$0xff]  ;;  %v116_v62 = vld [vmem:[#allocation13] sm:$0xff]  ;;  %vm312_vm7 = vcmp.ge.s32.totalorder %v311_v12, 48  ;;  %vm313_vm8 = vcmp.lt.s32.totalorder %v311_v12, 64  ;;  %v325_v28 = vld [vmem:[%s1007_s8] sm:$0xff] }
  0x74   :  { %121 = vst.msk [vmem:[#allocation5] sm:$0xff] %vm114_vm1, %v120_v47  ;;  %117 = vst.msk [vmem:[#allocation3] sm:$0xff] %vm114_vm1, %v116_v62  ;;  %vm315_vm10 = vcmp.ge.s32.totalorder %v311_v12, 112 }
  0x75   :  { %v123_v38 = vld [vmem:[#allocation2] sm:$0xff]  ;;  %vm314_vm9 = vmand %vm312_vm7, %vm313_vm8 }
  0x76   :  { %v125_v7 = vld [vmem:[#allocation4] sm:$0xff]  ;;  %546 = vmatpush3.bf16.msra.mxu1 %v545_v15  ;;  %vm316_vm11 = vmor %vm314_vm9, %vm315_vm10 }
  0x77   :  { %217 = vrot.lane.b32.xlu1 %v125_v7, %s774_s23  ;;  %547 = vmatprep.subr.bf16.mxu1 %v771_v0 }
  0x7a   :  { %549 = vmatpush3.bf16.msra.mxu1 %v548_v18 }
  0x7b   :  { %550 = vmatprep.subr.bf16.mxu1 %v771_v0  ;;  %v126_v3 = vld [vmem:[#allocation5] sm:$0xff]  ;;  %v124_v27 = vld [vmem:[#allocation3] sm:$0xff] }
  0x7e   :  { %552 = vmatpush3.bf16.msra.mxu1 %v551_v29  ;;  %v326_v29 = vmul.f32 %v325_v28, %v124_v27 }
  0x7f   :  { %553 = vmatprep.subr.bf16.mxu1 %v771_v0 }
  0x82   :  { %555 = vmatpush3.bf16.msra.mxu1 %v554_v32 }
  0x83   :  { %556 = vmatprep.subr.bf16.mxu1 %v771_v0 }
  0x86   :  { %558 = vmatpush3.bf16.msra.mxu1 %v557_v35 }
  0x9b   :  { %357 = vadd.xlane.f32.xlu1 %v356_v8 }
  0xe9   :  { %v218_v19 = vpop.permute.xlu1 %217 }
 0x128   :  { %v358_v20 = vpop.xlane.xlu1 %357 }
 0x129   :  { %v359_v21 = vrot.slane %v358_v20, 4 }
 0x12b   :  { %v360_v22 = vadd.f32 %v359_v21, %v358_v20 }
 0x12d   :  { %v361_v23 = vrot.slane %v360_v22, 2 }
 0x12f   :  { %v362_v24 = vadd.f32 %v361_v23, %v360_v22 }
 0x131   :  { %v363_v25 = vrot.slane %v362_v24, 1 }
 0x133   :  { %v364_v26 = vadd.f32 %v363_v25, %v362_v24 }
 0x135   :  { %559 = vpush %v364_v26 }
 0x146   :  { %v199_v36 = vpop.f32.mrb[0].mxu0 }
 0x147   :  { %205 = vrot.lane.b32.xlu0 %v199_v36, %s775_s5  ;;  %v510_v37 = vpop.f32.mrb[1].mxu0  ;;  %441 = vst.msk [vmem:[#allocation19] sm:$0xff] %vm381_vm2, %v199_v36  ;;  %v382_v43 = vsel %vm381_vm2, %v199_v36, 0.0 }
 0x14b   :  { %211 = vrot.lane.b32.xlu0 %v123_v38, %s776_s24 }
 0x166   :  { %s560_s25 = spop %559 }
 0x167   :  { %s366_s26 = smul.f32 0.0078125, %s560_s25 }
 0x169   :  { %v367_v39 = vstv %s366_s26 }
 0x16a   :  { %v368_v40 = vsub.f32 %v921_v4, %v367_v39  ;;  %v235_v4 = vld [vmem:[%s1006_s7] sm:$0xff]  ;;  %s777_s7 = smov 96  }
 0x16c   :  { %v369_v41 = vmul.f32 %v368_v40, %v368_v40 }
 0x16e   :  { %v370_v42 = vsel %vm114_vm1, %v369_v41, 0.0 }
 0x16f   :  { %371 = vadd.xlane.f32.xlu0 %v370_v42 }
 0x173   :  { %383 = vadd.xlane.f32.xlu0 %v382_v43 }
 0x1b9   :  { %v206_v44 = vpop.permute.xlu0 %205 }
 0x1ba   :  { %209 = vst.msk [vmem:[#allocation6] sm:$0xff] %vm208_vm3, %v206_v44 }
 0x1bd   :  { %v212_v45 = vpop.permute.xlu0 %211 }
 0x1be   :  { %215 = vst.msk [vmem:[#allocation6] sm:$0xff] %vm214_vm4, %v212_v45 }
 0x1bf   :  { %221 = vst.msk [vmem:[#allocation6] sm:$0xff] %vm220_vm5, %v218_v19 }
 0x1c6   :  { %v222_v46 = vld [vmem:[#allocation6] sm:$0xff] }
 0x1c7   :  { %536 = vmatmul.mubr.msk.f32.vlgmr.msra.gmra.mrb[0].mxu1 %vm236_vm6, %v222_v46 }
 0x1fc   :  { %v372_v48 = vpop.xlane.xlu0 %371 }
 0x1fd   :  { %v373_v49 = vrot.slane %v372_v48, 4 }
 0x1ff   :  { %v374_v50 = vadd.f32 %v373_v49, %v372_v48 }
 0x200   :  { %v384_v51 = vpop.xlane.xlu0 %383 }
 0x201   :  { %v375_v52 = vrot.slane %v374_v50, 2  ;;  %v385_v53 = vrot.slane %v384_v51, 4 }
 0x203   :  { %v386_v54 = vadd.f32 %v385_v53, %v384_v51  ;;  %v376_v55 = vadd.f32 %v375_v52, %v374_v50 }
 0x205   :  { %v387_v56 = vrot.slane %v386_v54, 2  ;;  %v377_v57 = vrot.slane %v376_v55, 1 }
 0x207   :  { %v378_v58 = vadd.f32 %v377_v57, %v376_v55  ;;  %v388_v59 = vadd.f32 %v387_v56, %v386_v54 }
 0x209   :  { %561 = vpush %v378_v58  ;;  %v389_v60 = vrot.slane %v388_v59, 1 }
 0x20b   :  { %v390_v61 = vadd.f32 %v389_v60, %v388_v59 }
 0x20d   :  { %563 = vpush %v390_v61 }
 0x23a   :  { %s942_s27 = spop %561 }
 0x23b   :  { %s380_s30 = smul.f32 0.007874016, %s942_s27 }
 0x23d   :  { %s413_s18 = smul.f32 %s380_s30, %s1008_s9 }
 0x23e   :  { %s564_s3 = spop %563 }
 0x23f   :  { %s392_s16 = smul.f32 0.0026041667, %s564_s3  ;;  %v414_v44 = vstv %s413_s18 }
 0x241   :  { %v393_v63 = vstv %s392_s16 }
 0x242   :  { %v394_v0 = vsub.f32 %v199_v36, %v393_v63 }
 0x244   :  { %v395_v1 = vmul.f32 %v394_v0, %v394_v0 }
 0x246   :  { %v396_v2 = vsel %vm381_vm2, %v395_v1, 0.0 }
 0x247   :  { %397 = vadd.xlane.f32.xlu0 %v396_v2 }
 0x25d   :  { %345 = vrot.lane.b32.xlu0 %v126_v3, %s776_s24 }
 0x29a   :  { %v306_v5 = vpop.f32.mrb[0].mxu1 }
 0x29b   :  { %v307_v6 = vadd.f32 %v306_v5, %v235_v4  ;;  %v537_v7 = vpop.f32.mrb[1].mxu1 }
 0x29d   :  { %v487_v8 = vmul.f32 -1.442695, %v307_v6 }
 0x29f   :  { %587 = vpow2.f32 %v487_v8 }
 0x2a0   :  { %589 = vtanh.f32 %v307_v6 }
 0x2a9   :  { %v588_v10 = vpop.eup %587 }
 0x2aa   :  { %v321_v11 = vadd.f32 1.0, %v588_v10  ;;  %v590_v13 = vpop.eup %589 }
 0x2ac   :  { %591 = vrcp.f32 %v321_v11 }
 0x2b6   :  { %v592_v14 = vpop.eup %591 }
 0x2b7   :  { %v324_v15 = vsel %vm316_vm11, %v590_v13, %v592_v14 }
 0x2b8   :  { %329 = vrot.lane.b32.xlu1 %v324_v15, %s777_s7  ;;  %v327_v32 = vmul.f32 %v326_v29, %v324_v15 }
 0x2d4   :  { %v398_v16 = vpop.xlane.xlu0 %397 }
 0x2d5   :  { %v399_v17 = vrot.slane %v398_v16, 4 }
 0x2d7   :  { %v400_v18 = vadd.f32 %v399_v17, %v398_v16 }
 0x2d8   :  { %v346_v30 = vpop.permute.xlu0 %345 }
 0x2d9   :  { %v401_v19 = vrot.slane %v400_v18, 2  ;;  %v348_v31 = vmul.f32 %v346_v30, %v324_v15 }
 0x2db   :  { %v402_v20 = vadd.f32 %v401_v19, %v400_v18 }
 0x2dd   :  { %v403_v21 = vrot.slane %v402_v20, 1 }
 0x2df   :  { %v404_v22 = vadd.f32 %v403_v21, %v402_v20 }
 0x2e1   :  { %565 = vpush %v404_v22 }
 0x312   :  { %s950_s28 = spop %565 }
 0x313   :  { %s406_s29 = smul.f32 0.002610966, %s950_s28 }
 0x315   :  { %s408_s13 = smul.f32 %s406_s29, %s1008_s9  ;;  %v416_v40 = vstv %s406_s29  ;;  %s780_s9 = smov [#allocation19]  }
 0x316   :  { %s473_s21 = sshll.u32 %s780_s9, 4  ;;  %s474_s21 = int_to_ptr.vmem [resolvable:$true] %s473_s21 }
 0x317   :  { %s409_s15 = sadd.f32 %s408_s13, %s380_s30  ;;  %s731_s6 = scalar_lea.vmem %s474_s21, 128 }
 0x318   :  { %p732_p6 = scmp.ne.s32.totalorder %s474_s21, %s731_s6  ;;  %p736_p7 = scmp.lt.s32.totalorder %s474_s21, %s474_s21 }
 0x319   :  { %v410_v23 = vstv %s409_s15  ;;  %p737_p8 = scmp.lt.s32.totalorder %s731_s6, %s731_s6 }
 0x31a   :  { %593 = vrcp.f32 %v410_v23 }
 0x31b   :  { %p738_p9 = por %p737_p8, %p736_p7 }
 0x31d   :  { %p739_p10 = pnand %p738_p9, %p732_p6 }
 0x324   :  { %v594_v24 = vpop.eup %593 }
 0x325   :  { %567 = vpush %v594_v24 }
 0x32a   :  { %v330_v25 = vpop.permute.xlu1 %329 }
 0x32b   :  { %v332_v26 = vmul.f32 %v330_v25, %v324_v15 }
 0x32d   :  { %334 = vrot.lane.b32.xlu1 %v332_v26, %s778_s1 }
 0x356   :  { %s568_s19 = spop %567 }
 0x357   :  { %v423_v48 = vstv %s568_s19 }
 0x39f   :  { %v335_v33 = vpop.permute.xlu1 %334 }
 0x3a0   :  { %v337_v34 = vadd.f32 %v335_v33, %v327_v32  ;;  %v349_v35 = vadd.f32 %v348_v31, %v335_v33 }
 0x3a2   :  { %430 = vst.msk [vmem:[#allocation3] sm:$0xff] %vm114_vm1, %v337_v34  ;;  %595 = vtanh.f32 %v349_v35 }
 0x3a3   :  { %597 = vtanh.f32 %v337_v34 }
 0x3ac   :  { %v596_v36 = vpop.eup %595 }
 0x3ad   :  { %352 = vrot.lane.b32.xlu1 %v596_v36, %s779_s0  ;;  %v598_v37 = vpop.eup %597 }
 0x3b1   :  { %340 = vrot.lane.b32.xlu1 %v598_v37, %s779_s0 }
 0x41f   :  { %v353_v38 = vpop.permute.xlu1 %352 }
 0x420   :  { %v355_v39 = vmul.f32 %v353_v38, %v324_v15 }
 0x422   :  { %v417_v41 = vmul.f32 %v416_v40, %v355_v39 }
 0x423   :  { %v341_v42 = vpop.permute.xlu1 %340 }
 0x424   :  { %v343_v43 = vmul.f32 %v341_v42, %v324_v15  ;;  %419 = vrot.lane.b32.xlu0 %v417_v41, %s776_s24 }
 0x426   :  { %442 = vrot.lane.b32.xlu1 %v343_v43, %s775_s5  ;;  %v415_v45 = vmul.f32 %v414_v44, %v343_v43 }
 0x428   :  { %448 = vrot.lane.b32.xlu0 %v337_v34, %s776_s24 }
 0x42a   :  { %452 = vrot.lane.b32.xlu1 %v355_v39, %s778_s1 }
 0x42c   :  { %456 = vrot.lane.b32.xlu0 %v349_v35, %s779_s0 }
 0x430   :  { %426 = vrot.lane.b32.xlu0 %v343_v43, %s777_s7 }
 0x434   :  { %437 = vrot.lane.b32.xlu0 %v349_v35, %s776_s24 }
 0x496   :  { %v420_v46 = vpop.permute.xlu0 %419 }
 0x497   :  { %v422_v47 = vadd.f32 %v420_v46, %v415_v45 }
 0x498   :  { %v443_v49 = vpop.permute.xlu1 %442 }
 0x499   :  { %v424_v50 = vmul.f32 %v423_v48, %v422_v47  ;;  %446 = vst.msk [vmem:[#allocation19] sm:$0xff] %vm445_vm12, %v443_v49 }
 0x49a   :  { %v449_v51 = vpop.permute.xlu0 %448 }
 0x49b   :  { %451 = vst.msk [vmem:[#allocation19] sm:$0xff] %vm214_vm4, %v449_v51  ;;  %462 = vrot.lane.b32.xlu1 %v424_v50, %s774_s23 }
 0x49c   :  { %v453_v52 = vpop.permute.xlu1 %452 }
 0x49d   :  { %455 = vst.msk [vmem:[#allocation19] sm:$0xff] %vm220_vm5, %v453_v52 }
 0x49e   :  { %v457_v53 = vpop.permute.xlu0 %456 }
 0x49f   :  { %460 = vst.msk [vmem:[#allocation19] sm:$0xff] %vm459_vm13, %v457_v53  ;;  %432 = vrot.lane.b32.xlu1 %v355_v39, %s779_s0 }
 0x4a2   :  { %v427_v54 = vpop.permute.xlu0 %426 }
 0x4a3   :  { %429 = vst.msk [vmem:[#allocation2] sm:$0xff] %vm114_vm1, %v427_v54 }
 0x4a6   :  { %v438_v55 = vpop.permute.xlu0 %437 }
 0x4a7   :  { %440 = vst.msk [vmem:[#allocation5] sm:$0xff] %vm114_vm1, %v438_v55 }
 0x50d   :  { %v463_v56 = vpop.permute.xlu1 %462 }
 0x50e   :  { %466 = vst.msk [vmem:[#allocation19] sm:$0xff] %vm465_vm14, %v463_v56 }
 0x50f   :  { %742 = shalt.err (!%p739_p10)
}
 0x510   :  { %s743_s5 = scalar_lea.hbm %s1009_s10, 128 }
 0x511   :  { %p744_p11 = scmp.ne.s32.totalorder %s1009_s10, %s743_s5  ;;  %p747_p12 = scmp.lt.u32.totalorder %s743_s5, %s1009_s10 }
 0x513   :  { %p749_p13 = pnand %p747_p12, %p744_p11 }
 0x515   :  { %752 = shalt.err (!%p749_p13)
}
 0x516   :  { %476 = dma.vmem_to_hbm [thread:$0]  %s474_s21, 128, %s1009_s10, [#allocation10]   ;;  %v433_v57 = vpop.permute.xlu1 %432 }
 0x517   :  { %435 = vst.msk [vmem:[#allocation4] sm:$0xff] %vm114_vm1, %v433_v57 }
 0x518   :  { %761 = dma.done.wait [#allocation10], 128  }
 0x519   :  { %762 = vsyncadd [#allocation10], 4294967168 }
 0x51a   :  { %480 = vsyncpa [#allocation9], 1 }
 0x51b   :  { %481 = vsyncpa [#allocation12], 1 }
 0x51c   :  { %482 = vsyncpa [#allocation15], 1 }
 0x51d   :  { %483 = vsyncpa [#allocation18], 1 }
 0x51e   :  { %484 = vsyncpa [#allocation10], 1 }

</bundles_post_ra>
